<compile_context>
chip_gen: v6e
topology: v6e:2x2x1
jax: 0.10.0
libtpu: 0.0.40
codegen_flags: <defaults>
</compile_context>

<pallas_src>
import functools
import math

import jax
import jax.numpy as jnp
from jax.experimental import pallas as pl
from jax.experimental.pallas import tpu as pltpu


# ----------------------------- Pallas kernel ---------------------------------
def _mha_kernel(q_ref, k_ref, v_ref,
                wq_ref, wk_ref, wv_ref, wo_ref,
                out_ref,
                *, num_heads, scale, matmul_dtype):
    f32 = jnp.float32
    md = matmul_dtype

    q = q_ref[...]                                     # (Tq, Dq_in)
    k = k_ref[...]                                     # (Skv, Dkv_in)
    v = v_ref[...]                                     # (Skv, Dkv_in)

    # Projections (bias=False Linears).  MXU operands in `md` (bf16 on
    # v6e/v7x), accumulation in f32.  Full-width projections keep the MXU
    # lanes dense; the head split happens afterwards as a single relayout.
    Q = jnp.dot(q.astype(md), wq_ref[...].astype(md),
                preferred_element_type=f32)            # (Tq, Qs)
    K = jnp.dot(k.astype(md), wk_ref[...].astype(md),
                preferred_element_type=f32)            # (Skv, Ks)
    V = jnp.dot(v.astype(md), wv_ref[...].astype(md),
                preferred_element_type=f32)            # (Skv, Vs)

    Tq, Qs = Q.shape
    Skv = K.shape[0]
    Vs = V.shape[1]
    H = num_heads
    dh_q = Qs // H
    dh_v = Vs // H

    # Fold 1/sqrt(d) into Q once (instead of scaling every (Tq, Skv) score map).
    Q = Q * scale

    # Head-major layout (H, S, dh): one relayout per tensor instead of
    # per-head lane slices / transposes / a final concat.
    Qh = pltpu.einshape("qhd->hqd", Q.reshape(Tq, H, dh_q))    # (H, Tq, dh_q)
    Kh = pltpu.einshape("khd->hkd", K.reshape(Skv, H, dh_q))   # (H, Skv, dh_q)
    Vh = pltpu.einshape("khd->hkd", V.reshape(Skv, H, dh_v))   # (H, Skv, dh_v)

    # Batched attention scores over heads (contracts dh; no explicit K.T).
    s = jnp.einsum("hqd,hkd->hqk", Qh.astype(md), Kh.astype(md),
                   preferred_element_type=f32)          # (H, Tq, Skv)

    # Softmax over keys, in f32 (dropout == identity in eval mode).
    s = s - jnp.max(s, axis=-1, keepdims=True)
    p = jnp.exp(s)
    p = p * pl.reciprocal(jnp.sum(p, axis=-1, keepdims=True), approx=True)

    # Weighted values: (H, Tq, dh_v).
    ctx = jnp.einsum("hqk,hkd->hqd", p.astype(md), Vh.astype(md),
                     preferred_element_type=f32)

    # transpose_output: (H, Tq, dh_v) -> (Tq, H*dh_v), then W_o projection.
    concat = pltpu.einshape("hqd->qhd", ctx).reshape(Tq, Vs)
    out = jnp.dot(concat.astype(md), wo_ref[...].astype(md),
                  preferred_element_type=f32)           # (Tq, Dq_out)
    out_ref[...] = out.astype(out_ref.dtype)


# --------------------------------- wrapper ------------------------------------
def mha_pallas(queries, keys, values, params, *, num_heads,
               matmul_dtype=jnp.bfloat16):
    wq, wk, wv, wo = params["wq"], params["wk"], params["wv"], params["wo"]

    Sq, Dq_in = queries.shape
    Skv, Dkv_in = keys.shape
    assert values.shape[0] == Skv and values.shape[1] == wv.shape[0]
    query_size = wq.shape[1]
    key_size = wk.shape[1]
    value_size = wv.shape[1]
    out_dim = wo.shape[1]
    assert query_size == key_size, "per-head Q/K dims must match"
    assert query_size % num_heads == 0 and value_size % num_heads == 0

    scale = 1.0 / math.sqrt(query_size // num_heads)

    # Sq tiling: parallel grid axis (shards rows across v7x's two TensorCores
    # and double-buffers the q/out tiles).  Tile must be a multiple of 8 or
    # the full extent.
    tile_sq = Sq
    for cand in (512, 256, 128, 64, 32, 16, 8):
        if Sq % cand == 0:
            tile_sq = cand
            break
    grid = (Sq // tile_sq,)

    # VMEM budget derived from the real buffers (double-buffered pipeline
    # blocks + f32 intermediates) with ~2x headroom; clamped well below v7x's
    # 64 MiB physical VMEM.
    block_bytes = 4 * (tile_sq * Dq_in + 2 * Skv * Dkv_in
                       + wq.size + wk.size + wv.size + wo.size
                       + tile_sq * out_dim)
    inter_bytes = 4 * (tile_sq * (query_size + value_size)        # Q, ctx/concat
                       + Skv * (key_size + value_size)            # K, V
                       + 2 * num_heads * tile_sq * Skv)           # scores, probs
    vmem_limit = int(2 * (2 * block_bytes + inter_bytes)) + (2 << 20)
    vmem_limit = min(max(vmem_limit, 4 << 20), 32 << 20)

    # Cost hint so XLA does not treat the fused call as free.
    flops = 2 * (Sq * Dq_in * query_size
                 + Skv * Dkv_in * key_size
                 + Skv * Dkv_in * value_size
                 + Sq * Skv * (query_size + value_size)
                 + Sq * value_size * out_dim)
    transcendentals = num_heads * Sq * Skv
    bytes_accessed = 4 * (queries.size + keys.size + values.size
                          + wq.size + wk.size + wv.size + wo.size
                          + Sq * out_dim)
    cost = pl.CostEstimate(flops=flops, transcendentals=transcendentals,
                           bytes_accessed=bytes_accessed)

    kernel = functools.partial(_mha_kernel, num_heads=num_heads, scale=scale,
                               matmul_dtype=matmul_dtype)

    full = lambda shape: pl.BlockSpec(shape, lambda i: (0,) * len(shape))

    return pl.pallas_call(
        kernel,
        out_shape=jax.ShapeDtypeStruct((Sq, out_dim), jnp.float32),
        grid=grid,
        in_specs=[
            pl.BlockSpec((tile_sq, Dq_in), lambda i: (i, 0)),   # queries (tiled)
            full(keys.shape),                                   # keys   (resident)
            full(values.shape),                                 # values (resident)
            full(wq.shape), full(wk.shape), full(wv.shape), full(wo.shape),
        ],
        out_specs=pl.BlockSpec((tile_sq, out_dim), lambda i: (i, 0)),
        compiler_params=pltpu.CompilerParams(
            dimension_semantics=("parallel",),
            vmem_limit_bytes=vmem_limit),
        cost_estimate=cost,
    )(queries, keys, values, wq, wk, wv, wo)


# ------------------------- pure-JAX reference (for check) ---------------------
def mha_ref(queries, keys, values, params, *, num_heads):
    wq, wk, wv, wo = params["wq"], params["wk"], params["wv"], params["wo"]
    with jax.default_matmul_precision("highest"):
        Q = queries @ wq
        K = keys @ wk
        V = values @ wv

        def split(x):
            S, D = x.shape
            return x.reshape(S, num_heads, D // num_heads).transpose(1, 0, 2)

        Qp, Kp, Vp = split(Q), split(K), split(V)
        d = Qp.shape[-1]
        scores = jnp.einsum("hqd,hkd->hqk", Qp, Kp) / jnp.sqrt(jnp.float32(d))
        w = jax.nn.softmax(scores, axis=-1)
        out = jnp.einsum("hqk,hkd->hqd", w, Vp)          # (H, Sq, dh_v)
        out = out.transpose(1, 0, 2).reshape(queries.shape[0], -1)
        return out @ wo


# --------------------------------- driver -------------------------------------
if __name__ == "__main__":
    # Module hyper-parameters (small, consistent with the forward pass).
    q_in_dim = 32
    kv_in_dim = 32
    key_size = 32
    query_size = 32
    value_size = 32
    num_heads = 4
    Sq, Skv = 8, 16

    key = jax.random.PRNGKey(0)
    ks = jax.random.split(key, 7)

    queries = jax.random.normal(ks[0], (Sq, q_in_dim), jnp.float32)
    keys_in = jax.random.normal(ks[1], (Skv, kv_in_dim), jnp.float32)
    values_in = jax.random.normal(ks[2], (Skv, kv_in_dim), jnp.float32)

    # Linear weights stored as (in_dim, out_dim) == PyTorch weight.T.
    params = {
        "wq": jax.random.normal(ks[3], (q_in_dim, query_size), jnp.float32) * 0.1,
        "wk": jax.random.normal(ks[4], (kv_in_dim, key_size), jnp.float32) * 0.1,
        "wv": jax.random.normal(ks[5], (kv_in_dim, value_size), jnp.float32) * 0.1,
        "wo": jax.random.normal(ks[6], (value_size, q_in_dim), jnp.float32) * 0.1,
    }

    out = mha_pallas(queries, keys_in, values_in, params, num_heads=num_heads)
    out = jax.block_until_ready(out)

    ref = mha_ref(queries, keys_in, values_in, params, num_heads=num_heads)

    # bf16 MXU operands + approx EUP reciprocal -> compare at a bf16-level
    # tolerance against a highest-precision f32 reference.
    if not jnp.allclose(out, ref, atol=2e-2, rtol=2e-2):
        err = float(jnp.max(jnp.abs(out - ref)))
        raise AssertionError(f"Pallas kernel does not match reference (max abs err {err:.3e})")

    print("KERNEL_OK")
</pallas_src>

<mosaic_0001>
module attributes {stable_mosaic.version = 11 : i64} {
  func.func @_mha_kernel(%arg0: i32, %arg1: memref<8x32xf32, #tpu.memory_space<vmem>>, %arg2: memref<16x32xf32, #tpu.memory_space<vmem>>, %arg3: memref<16x32xf32, #tpu.memory_space<vmem>>, %arg4: memref<32x32xf32, #tpu.memory_space<vmem>>, %arg5: memref<32x32xf32, #tpu.memory_space<vmem>>, %arg6: memref<32x32xf32, #tpu.memory_space<vmem>>, %arg7: memref<32x32xf32, #tpu.memory_space<vmem>>, %arg8: memref<8x32xf32, #tpu.memory_space<vmem>>) attributes {dimension_semantics = [#tpu.dimension_semantics<parallel>], iteration_bounds = array<i64: 1>, scalar_prefetch = 0 : i64, scratch_operands = 0 : i64, tpu.core_type = #tpu.core_type<tc>, window_params = [{transform_indices = @transform_0, window_bounds = array<i64: 8, 32>}, {pipeline_mode = #tpu.pipeline_mode<synchronous>, transform_indices = @transform_1, window_bounds = array<i64: 16, 32>}, {pipeline_mode = #tpu.pipeline_mode<synchronous>, transform_indices = @transform_2, window_bounds = array<i64: 16, 32>}, {pipeline_mode = #tpu.pipeline_mode<synchronous>, transform_indices = @transform_3, window_bounds = array<i64: 32, 32>}, {pipeline_mode = #tpu.pipeline_mode<synchronous>, transform_indices = @transform_4, window_bounds = array<i64: 32, 32>}, {pipeline_mode = #tpu.pipeline_mode<synchronous>, transform_indices = @transform_5, window_bounds = array<i64: 32, 32>}, {pipeline_mode = #tpu.pipeline_mode<synchronous>, transform_indices = @transform_6, window_bounds = array<i64: 32, 32>}, {transform_indices = @transform_7, window_bounds = array<i64: 8, 32>}]} {
    %c0 = arith.constant 0 : index
    %c0_0 = arith.constant 0 : index
    %0 = vector.load %arg1[%c0, %c0_0] : memref<8x32xf32, #tpu.memory_space<vmem>>, vector<8x32xf32>
    %c0_1 = arith.constant 0 : index
    %c0_2 = arith.constant 0 : index
    %1 = vector.load %arg2[%c0_1, %c0_2] : memref<16x32xf32, #tpu.memory_space<vmem>>, vector<16x32xf32>
    %c0_3 = arith.constant 0 : index
    %c0_4 = arith.constant 0 : index
    %2 = vector.load %arg3[%c0_3, %c0_4] : memref<16x32xf32, #tpu.memory_space<vmem>>, vector<16x32xf32>
    %3 = arith.truncf %0 : vector<8x32xf32> to vector<8x32xbf16>
    %c0_5 = arith.constant 0 : index
    %c0_6 = arith.constant 0 : index
    %4 = vector.load %arg4[%c0_5, %c0_6] : memref<32x32xf32, #tpu.memory_space<vmem>>, vector<32x32xf32>
    %5 = arith.truncf %4 : vector<32x32xf32> to vector<32x32xbf16>
    %cst = arith.constant dense<0.000000e+00> : vector<8x32xf32>
    %6 = tpu.matmul %3, %5, %cst {dimension_numbers = #tpu.dot_dimension_numbers<[1], [0], [0], [1], [0, 0, 1, 1], [], []>} : vector<8x32xbf16>, vector<32x32xbf16>, vector<8x32xf32> -> vector<8x32xf32>
    %7 = arith.truncf %1 : vector<16x32xf32> to vector<16x32xbf16>
    %c0_7 = arith.constant 0 : index
    %c0_8 = arith.constant 0 : index
    %8 = vector.load %arg5[%c0_7, %c0_8] : memref<32x32xf32, #tpu.memory_space<vmem>>, vector<32x32xf32>
    %9 = arith.truncf %8 : vector<32x32xf32> to vector<32x32xbf16>
    %cst_9 = arith.constant dense<0.000000e+00> : vector<16x32xf32>
    %10 = tpu.matmul %7, %9, %cst_9 {dimension_numbers = #tpu.dot_dimension_numbers<[1], [0], [0], [1], [0, 0, 1, 1], [], []>} : vector<16x32xbf16>, vector<32x32xbf16>, vector<16x32xf32> -> vector<16x32xf32>
    %11 = arith.truncf %2 : vector<16x32xf32> to vector<16x32xbf16>
    %c0_10 = arith.constant 0 : index
    %c0_11 = arith.constant 0 : index
    %12 = vector.load %arg6[%c0_10, %c0_11] : memref<32x32xf32, #tpu.memory_space<vmem>>, vector<32x32xf32>
    %13 = arith.truncf %12 : vector<32x32xf32> to vector<32x32xbf16>
    %cst_12 = arith.constant dense<0.000000e+00> : vector<16x32xf32>
    %14 = tpu.matmul %11, %13, %cst_12 {dimension_numbers = #tpu.dot_dimension_numbers<[1], [0], [0], [1], [0, 0, 1, 1], [], []>} : vector<16x32xbf16>, vector<32x32xbf16>, vector<16x32xf32> -> vector<16x32xf32>
    %cst_13 = arith.constant 0.353553385 : f32
    %15 = vector.broadcast %cst_13 : f32 to vector<8x32xf32>
    %16 = arith.mulf %6, %15 : vector<8x32xf32>
    %17 = vector.shape_cast %16 : vector<8x32xf32> to vector<8x4x8xf32>
    %18 = tpu.transpose %17, [1, 0, 2] : vector<8x4x8xf32> -> vector<4x8x8xf32>
    %19 = vector.shape_cast %10 : vector<16x32xf32> to vector<16x4x8xf32>
    %20 = tpu.transpose %19, [1, 0, 2] : vector<16x4x8xf32> -> vector<4x16x8xf32>
    %21 = vector.shape_cast %14 : vector<16x32xf32> to vector<16x4x8xf32>
    %22 = tpu.transpose %21, [1, 0, 2] : vector<16x4x8xf32> -> vector<4x16x8xf32>
    %23 = arith.truncf %18 : vector<4x8x8xf32> to vector<4x8x8xbf16>
    %24 = arith.truncf %20 : vector<4x16x8xf32> to vector<4x16x8xbf16>
    "tpu.trace_start"() <{level = 10 : i32, message = "hqd,hkd->hqk"}> : () -> ()
    %cst_14 = arith.constant dense<0.000000e+00> : vector<4x8x16xf32>
    %25 = tpu.matmul %23, %24, %cst_14 {dimension_numbers = #tpu.dot_dimension_numbers<[2], [2], [1], [1], [0, 0, 0, 1, 1, 1], [0], [0]>} : vector<4x8x8xbf16>, vector<4x16x8xbf16>, vector<4x8x16xf32> -> vector<4x8x16xf32>
    "tpu.trace_stop"() : () -> ()
    %cst_15 = arith.constant dense<0xFF800000> : vector<4x8xf32>
    %26 = vector.multi_reduction <maximumf>, %25, %cst_15 [2] : vector<4x8x16xf32> to vector<4x8xf32>
    %27 = vector.shape_cast %26 : vector<4x8xf32> to vector<4x8x1xf32>
    %28 = vector.broadcast %27 : vector<4x8x1xf32> to vector<4x8x16xf32>
    %29 = arith.subf %25, %28 : vector<4x8x16xf32>
    %30 = math.exp %29 : vector<4x8x16xf32>
    %cst_16 = arith.constant dense<0.000000e+00> : vector<4x8xf32>
    %31 = vector.multi_reduction <add>, %30, %cst_16 [2] : vector<4x8x16xf32> to vector<4x8xf32>
    %32 = vector.shape_cast %31 : vector<4x8xf32> to vector<4x8x1xf32>
    %33 = tpu.reciprocal %32 {approx = true} : vector<4x8x1xf32> -> vector<4x8x1xf32>
    %34 = vector.broadcast %33 : vector<4x8x1xf32> to vector<4x8x16xf32>
    %35 = arith.mulf %30, %34 : vector<4x8x16xf32>
    %36 = arith.truncf %35 : vector<4x8x16xf32> to vector<4x8x16xbf16>
    %37 = arith.truncf %22 : vector<4x16x8xf32> to vector<4x16x8xbf16>
    "tpu.trace_start"() <{level = 10 : i32, message = "hqk,hkd->hqd"}> : () -> ()
    %cst_17 = arith.constant dense<0.000000e+00> : vector<4x8x8xf32>
    %38 = tpu.matmul %36, %37, %cst_17 {dimension_numbers = #tpu.dot_dimension_numbers<[2], [1], [1], [2], [0, 0, 0, 1, 1, 2], [0], [0]>} : vector<4x8x16xbf16>, vector<4x16x8xbf16>, vector<4x8x8xf32> -> vector<4x8x8xf32>
    "tpu.trace_stop"() : () -> ()
    %39 = tpu.transpose %38, [1, 0, 2] : vector<4x8x8xf32> -> vector<8x4x8xf32>
    %40 = vector.shape_cast %39 : vector<8x4x8xf32> to vector<8x32xf32>
    %41 = arith.truncf %40 : vector<8x32xf32> to vector<8x32xbf16>
    %c0_18 = arith.constant 0 : index
    %c0_19 = arith.constant 0 : index
    %42 = vector.load %arg7[%c0_18, %c0_19] : memref<32x32xf32, #tpu.memory_space<vmem>>, vector<32x32xf32>
    %43 = arith.truncf %42 : vector<32x32xf32> to vector<32x32xbf16>
    %cst_20 = arith.constant dense<0.000000e+00> : vector<8x32xf32>
    %44 = tpu.matmul %41, %43, %cst_20 {dimension_numbers = #tpu.dot_dimension_numbers<[1], [0], [0], [1], [0, 0, 1, 1], [], []>} : vector<8x32xbf16>, vector<32x32xbf16>, vector<8x32xf32> -> vector<8x32xf32>
    %c0_21 = arith.constant 0 : index
    %c0_22 = arith.constant 0 : index
    %45 = vector.load %arg8[%c0_21, %c0_22] : memref<8x32xf32, #tpu.memory_space<vmem>>, vector<8x32xf32>
    tpu.vector_store %arg8[%c0_21, %c0_22], %44 {strides = array<i32>} : memref<8x32xf32, #tpu.memory_space<vmem>>, vector<8x32xf32>,
    return
  }
  func.func @transform_0(%arg0: i32) -> (i32, i32) {
    %c0_i32 = arith.constant 0 : i32
    %c0_i32_0 = arith.constant 0 : i32
    return %arg0, %c0_i32 : i32, i32
  }
  func.func @transform_1(%arg0: i32) -> (i32, i32) {
    %c0_i32 = arith.constant 0 : i32
    %c0_i32_0 = arith.constant 0 : i32
    %c0_i32_1 = arith.constant 0 : i32
    return %c0_i32, %c0_i32_0 : i32, i32
  }
  func.func @transform_2(%arg0: i32) -> (i32, i32) {
    %c0_i32 = arith.constant 0 : i32
    %c0_i32_0 = arith.constant 0 : i32
    %c0_i32_1 = arith.constant 0 : i32
    return %c0_i32, %c0_i32_0 : i32, i32
  }
  func.func @transform_3(%arg0: i32) -> (i32, i32) {
    %c0_i32 = arith.constant 0 : i32
    %c0_i32_0 = arith.constant 0 : i32
    %c0_i32_1 = arith.constant 0 : i32
    return %c0_i32, %c0_i32_0 : i32, i32
  }
  func.func @transform_4(%arg0: i32) -> (i32, i32) {
    %c0_i32 = arith.constant 0 : i32
    %c0_i32_0 = arith.constant 0 : i32
    %c0_i32_1 = arith.constant 0 : i32
    return %c0_i32, %c0_i32_0 : i32, i32
  }
  func.func @transform_5(%arg0: i32) -> (i32, i32) {
    %c0_i32 = arith.constant 0 : i32
    %c0_i32_0 = arith.constant 0 : i32
    %c0_i32_1 = arith.constant 0 : i32
    return %c0_i32, %c0_i32_0 : i32, i32
  }
  func.func @transform_6(%arg0: i32) -> (i32, i32) {
    %c0_i32 = arith.constant 0 : i32
    %c0_i32_0 = arith.constant 0 : i32
    %c0_i32_1 = arith.constant 0 : i32
    return %c0_i32, %c0_i32_0 : i32, i32
  }
  func.func @transform_7(%arg0: i32) -> (i32, i32) {
    %c0_i32 = arith.constant 0 : i32
    %c0_i32_0 = arith.constant 0 : i32
    return %arg0, %c0_i32 : i32, i32
  }
}

</mosaic_0001>

<bundles_post_ra>
// kernel: tpu_custom_call.1
= control target key start
LH: loop header
LB: loop body
LE: loop exit
PB: predicated region body
PF: predicated region fallthrough
CT: control target
= control target key end

     0   :  { %12 = vsyncpa [#allocation3], 0  ;;  %s2318_s0 = inlined_call_operand.hbm [shape: f32[8,32], index: 0, kind: input, shape index: {}]   ;;  %s2319_s1 = inlined_call_operand.hbm [shape: f32[16,32], index: 1, kind: input, shape index: {}]   ;;  %s2320_s2 = inlined_call_operand.hbm [shape: f32[16,32], index: 2, kind: input, shape index: {}]   ;;  %s2321_s3 = inlined_call_operand.hbm [shape: f32[32,32], index: 3, kind: input, shape index: {}]   ;;  %s2322_s4 = inlined_call_operand.hbm [shape: f32[32,32], index: 4, kind: input, shape index: {}]   ;;  %s2323_s5 = inlined_call_operand.hbm [shape: f32[32,32], index: 5, kind: input, shape index: {}]   ;;  %s2324_s6 = inlined_call_operand.hbm [shape: f32[32,32], index: 6, kind: input, shape index: {}]   ;;  %s2325_s7 = inlined_call_operand.hbm [shape: f32[8,32], index: 7, kind: output, shape index: {}]  }
   0x1   :  { %13 = vsyncpa [#allocation6], 0 }
   0x2   :  { %14 = vsyncpa [#allocation9], 0 }
   0x3   :  { %15 = vsyncpa [#allocation12], 0 }
   0x4   :  { %16 = vsyncpa [#allocation4], 0  ;;  %s1986_s24 = smov [#allocation5]  }
   0x5   :  { %s32_s25 = sshll.u32 %s1986_s24, 4  ;;  %s33_s25 = int_to_ptr.vmem [resolvable:$true] %s32_s25 }
   0x6   :  { %s1824_s26 = scalar_lea.vmem %s33_s25, 256  ;;  %p1829_p1 = scmp.lt.s32.totalorder %s33_s25, %s33_s25 }
   0x7   :  { %p1825_p0 = scmp.ne.s32.totalorder %s33_s25, %s1824_s26  ;;  %p1830_p2 = scmp.lt.s32.totalorder %s1824_s26, %s1824_s26 }
   0x9   :  { %p1831_p3 = por %p1830_p2, %p1829_p1 }
   0xb   :  { %p1832_p4 = pnand %p1831_p3, %p1825_p0 }
   0xd   :  { %1835 = shalt.err (!%p1832_p4)
}
   0xe   :  { %s1987_s27 = smov 128   ;;  %s1988_s28 = smov 8  }
   0xf   :  { %38 = dma.hbm_to_vmem [thread:$0]  %s2319_s1, 256, %s33_s25, [#allocation6], %s1987_s27, %s1987_s27, %s1988_s28  }
  0x10   :  { %s1989_s8 = smov [#allocation8]   ;;  %s1990_s10 = smov [#allocation11]  }
  0x11   :  { %s56_s9 = sshll.u32 %s1989_s8, 4  ;;  %s80_s11 = sshll.u32 %s1990_s10, 4  ;;  %s57_s9 = int_to_ptr.vmem [resolvable:$true] %s56_s9  ;;  %s81_s11 = int_to_ptr.vmem [resolvable:$true] %s80_s11 }
  0x12   :  { %s1844_s12 = scalar_lea.vmem %s57_s9, 512  ;;  %p1849_p6 = scmp.lt.s32.totalorder %s57_s9, %s57_s9 }
  0x13   :  { %p1845_p5 = scmp.ne.s32.totalorder %s57_s9, %s1844_s12  ;;  %p1850_p7 = scmp.lt.s32.totalorder %s1844_s12, %s1844_s12 }
  0x15   :  { %p1851_p8 = por %p1850_p7, %p1849_p6 }
  0x17   :  { %p1852_p9 = pnand %p1851_p8, %p1845_p5 }
  0x19   :  { %1855 = shalt.err (!%p1852_p9)
}
  0x1a   :  { %62 = dma.hbm_to_vmem [thread:$0]  %s2321_s3, 512, %s57_s9, [#allocation9], %s1987_s27, %s1987_s27, %s1988_s28  }
  0x1b   :  { %s1864_s1 = scalar_lea.vmem %s81_s11, 512  ;;  %p1869_p11 = scmp.lt.s32.totalorder %s81_s11, %s81_s11 }
  0x1c   :  { %p1865_p10 = scmp.ne.s32.totalorder %s81_s11, %s1864_s1  ;;  %p1870_p12 = scmp.lt.s32.totalorder %s1864_s1, %s1864_s1 }
  0x1e   :  { %p1871_p13 = por %p1870_p12, %p1869_p11 }
  0x20   :  { %p1872_p0 = pnand %p1871_p13, %p1865_p10 }
  0x22   :  { %1875 = shalt.err (!%p1872_p0)
}
  0x23   :  { %86 = dma.hbm_to_vmem [thread:$0]  %s2323_s5, 512, %s81_s11, [#allocation12], %s1987_s27, %s1987_s27, %s1988_s28  }
  0x24   :  { %s1991_s17 = smov [#allocation2]   ;;  %s1992_s19 = smov [#allocation7]  }
  0x25   :  { %s23_s18 = sshll.u32 %s1991_s17, 4  ;;  %s44_s3 = sshll.u32 %s1992_s19, 4  ;;  %s24_s18 = int_to_ptr.vmem [resolvable:$true] %s23_s18  ;;  %s45_s3 = int_to_ptr.vmem [resolvable:$true] %s44_s3 }
  0x26   :  { %s1884_s20 = scalar_lea.vmem %s24_s18, 128  ;;  %p1889_p2 = scmp.lt.s32.totalorder %s24_s18, %s24_s18 }
  0x27   :  { %p1885_p1 = scmp.ne.s32.totalorder %s24_s18, %s1884_s20  ;;  %p1890_p3 = scmp.lt.s32.totalorder %s1884_s20, %s1884_s20 }
  0x29   :  { %p1891_p4 = por %p1890_p3, %p1889_p2 }
  0x2b   :  { %p1892_p5 = pnand %p1891_p4, %p1885_p1 }
  0x2d   :  { %1895 = shalt.err (!%p1892_p5)
}
  0x2e   :  { %26 = dma.hbm_to_vmem [thread:$0]  %s2318_s0, 128, %s24_s18, [#allocation3]  }
  0x2f   :  { %s1904_s23 = scalar_lea.vmem %s45_s3, 256  ;;  %p1909_p7 = scmp.lt.s32.totalorder %s45_s3, %s45_s3 }
  0x30   :  { %p1905_p6 = scmp.ne.s32.totalorder %s45_s3, %s1904_s23  ;;  %p1910_p8 = scmp.lt.s32.totalorder %s1904_s23, %s1904_s23 }
  0x32   :  { %p1911_p9 = por %p1910_p8, %p1909_p7 }
  0x34   :  { %p1912_p10 = pnand %p1911_p9, %p1905_p6 }
  0x36   :  { %1915 = shalt.err (!%p1912_p10)
}
  0x37   :  { %50 = dma.hbm_to_vmem [thread:$0]  %s2320_s2, 256, %s45_s3, [#allocation6], %s1987_s27, %s1987_s27, %s1988_s28  }
  0x38   :  { %s1993_s25 = smov [#allocation10]   ;;  %s1994_s29 = smov [#allocation13]  }
  0x39   :  { %s68_s26 = sshll.u32 %s1993_s25, 4  ;;  %s92_s0 = sshll.u32 %s1994_s29, 4  ;;  %s69_s26 = int_to_ptr.vmem [resolvable:$true] %s68_s26  ;;  %s93_s0 = int_to_ptr.vmem [resolvable:$true] %s92_s0 }
  0x3a   :  { %s1924_s30 = scalar_lea.vmem %s69_s26, 512  ;;  %p1929_p12 = scmp.lt.s32.totalorder %s69_s26, %s69_s26 }
  0x3b   :  { %p1925_p11 = scmp.ne.s32.totalorder %s69_s26, %s1924_s30  ;;  %p1930_p13 = scmp.lt.s32.totalorder %s1924_s30, %s1924_s30 }
  0x3d   :  { %p1931_p0 = por %p1930_p13, %p1929_p12 }
  0x3f   :  { %p1932_p1 = pnand %p1931_p0, %p1925_p11 }
  0x41   :  { %1935 = shalt.err (!%p1932_p1)
}
  0x42   :  { %74 = dma.hbm_to_vmem [thread:$0]  %s2322_s4, 512, %s69_s26, [#allocation9], %s1987_s27, %s1987_s27, %s1988_s28  }
  0x43   :  { %s1944_s2 = scalar_lea.vmem %s93_s0, 512  ;;  %p1949_p3 = scmp.lt.s32.totalorder %s93_s0, %s93_s0 }
  0x44   :  { %p1945_p2 = scmp.ne.s32.totalorder %s93_s0, %s1944_s2  ;;  %p1950_p4 = scmp.lt.s32.totalorder %s1944_s2, %s1944_s2 }
  0x46   :  { %p1951_p5 = por %p1950_p4, %p1949_p3 }
  0x48   :  { %p1952_p6 = pnand %p1951_p5, %p1945_p2 }
  0x4a   :  { %1955 = shalt.err (!%p1952_p6)
}
  0x4b   :  { %98 = dma.hbm_to_vmem [thread:$0]  %s2324_s6, 512, %s93_s0, [#allocation12], %s1987_s27, %s1987_s27, %s1988_s28  }
  0x4c   :  { %1976 = dma.done.wait [#allocation3], 128  }
  0x4d   :  { %1977 = vsyncadd [#allocation3], 4294967168 }
  0x4e   :  { %1978 = dma.done.wait [#allocation6], 512  }
  0x4f   :  { %1979 = vsyncadd [#allocation6], 4294966784 }
  0x50   :  { %1980 = dma.done.wait [#allocation9], 1024  }
  0x51   :  { %1981 = vsyncadd [#allocation9], 4294966272 }
  0x52   :  { %1982 = dma.done.wait [#allocation12], 1024  }
  0x53   :  { %1983 = vsyncadd [#allocation12], 4294966272  ;;  %v1995_v0 = vmov 0.0   ;;  %vm1996_vm0 = vmmov 0   ;;  %v180_v1 = vld [vmem:[#allocation10 + $0x10] sm:$0xff]  ;;  %v181_v2 = vld [vmem:[#allocation10 + $0x18] sm:$0xff]  ;;  %v295_v42 = vlaneseq }
  0x54   :  { %1709 = vmatprep.subr.bf16.mxu1 %v1995_v0  ;;  %1701 = vmatprep.subr.bf16.mxu0 %v1995_v0  ;;  %v178_v3 = vld [vmem:[#allocation10] sm:$0xff]  ;;  %v183_v4 = vpack.c.bf16 %v181_v2, %v180_v1  ;;  %v179_v5 = vld [vmem:[#allocation10 + $0x8] sm:$0xff]  ;;  %v129_v6 = vld [vmem:[#allocation8 + $0x10] sm:$0xff]  ;;  %vm133_vm1 = vcmask 261120   ;;  %s1997_s4 = smov 112   ;;  %s1998_s6 = smov 120  }
  0x55   :  { %1713 = vmatprep.mubr.msk.bf16.mxu1 %vm1996_vm0, %v1995_v0  ;;  %1705 = vmatprep.mubr.msk.bf16.mxu0 %vm1996_vm0, %v1995_v0  ;;  %v130_v7 = vld [vmem:[#allocation8 + $0x18] sm:$0xff]  ;;  %v127_v9 = vld [vmem:[#allocation8] sm:$0xff]  ;;  %v182_v10 = vpack.c.bf16 %v179_v5, %v178_v3  ;;  %v123_v12 = vld [vmem:[#allocation5 + $0x8] sm:$0xff]  ;;  %s1999_s27 = smov 104   ;;  %v2000_v40 = vmov 1983009808  }
  0x56   :  { %v132_v8 = vpack.c.bf16 %v130_v7, %v129_v6  ;;  %1710 = vmatpush3.bf16.msra.mxu1 %v183_v4  ;;  %v122_v11 = vld [vmem:[#allocation5] sm:$0xff]  ;;  %v128_v13 = vld [vmem:[#allocation8 + $0x8] sm:$0xff]  ;;  %v121_v15 = vld [vmem:[#allocation2] sm:$0xff]  ;;  %v293_v41 = vunpack.c.l.s4 %v2000_v40  ;;  %v2001_v43 = vmov 1934713408   ;;  %v296_v46 = vshrl.u32 %v295_v42, 7 }
  0x57   :  { %1711 = vmatprep.subr.bf16.mxu1 %v1995_v0  ;;  %v131_v14 = vpack.c.bf16 %v128_v13, %v127_v9  ;;  %v177_v16 = vpack.c.bf16 %v123_v12, %v122_v11  ;;  %v126_v17 = vpack.c.bf16 %v121_v15, %v121_v15  ;;  %v231_v18 = vld [vmem:[#allocation11 + $0x10] sm:$0xff]  ;;  %v232_v19 = vld [vmem:[#allocation11 + $0x18] sm:$0xff]  ;;  %v229_v20 = vld [vmem:[#allocation11] sm:$0xff]  ;;  %v325_v44 = vunpack.c.l.s4 %v2001_v43  ;;  %s2002_s12 = smov 16   ;;  %s2003_s13 = smov 24  }
  0x58   :  { %1702 = vmatpush3.bf16.msra.mxu0 %v132_v8  ;;  %v234_v21 = vpack.c.bf16 %v232_v19, %v231_v18  ;;  %v230_v22 = vld [vmem:[#allocation11 + $0x8] sm:$0xff]  ;;  %v124_v24 = vld [vmem:[#allocation7] sm:$0xff]  ;;  %v125_v25 = vld [vmem:[#allocation7 + $0x8] sm:$0xff]  ;;  %v294_v45 = vunpack.c.0.s8 %v293_v41  ;;  %vm1018_vm2 = vcmask 64512   ;;  %vm1203_vm3 = vcmask 130048   ;;  %s2004_s14 = smov [#allocation14]  }
  0x59   :  { %1703 = vmatprep.subr.bf16.mxu0 %v1995_v0  ;;  %v233_v23 = vpack.c.bf16 %v230_v22, %v229_v20  ;;  %v228_v26 = vpack.c.bf16 %v125_v25, %v124_v24  ;;  %v326_v49 = vunpack.c.0.s8 %v325_v44  ;;  %vm1578_vm4 = vcmask 195584   ;;  %s1637_s1 = sshll.u32 %s2004_s14, 4  ;;  %s1638_s1 = int_to_ptr.vmem [resolvable:$true] %s1637_s1 }
  0x5a   :  { %1712 = vmatpush3.bf16.msra.mxu1 %v182_v10  ;;  %v2122_v50 = vsub.s32 %v294_v45, %v296_v46  ;;  %p1961_p8 = scmp.lt.s32.totalorder %s1638_s1, %s1638_s1 }
  0x5b   :  { %1725 = vmatprep.subr.bf16.mxu1 %v1995_v0  ;;  %v2124_v57 = vsub.s32 %v326_v49, %v296_v46 }
  0x5c   :  { %1704 = vmatpush3.bf16.msra.mxu0 %v131_v14 }
  0x5d   :  { %1717 = vmatprep.subr.bf16.mxu0 %v1995_v0  ;;  %1714 = vmatmul.mubr.msk.bf16.vlgmr.msra.gmra.mxu1 %vm133_vm1, %v177_v16 }
  0x5e   :  { %1727 = vmatprep.mubr.msk.bf16.mxu1 %vm1996_vm0, %v1995_v0 }
  0x5f   :  { %1706 = vmatmul.mubr.msk.bf16.vlgmr.msra.gmra.mxu0 %vm133_vm1, %v126_v17 }
  0x60   :  { %1721 = vmatprep.mubr.msk.bf16.mxu0 %vm1996_vm0, %v1995_v0  ;;  %1718 = vmatpush3.bf16.msra.mxu0 %v234_v21 }
  0x61   :  { %1719 = vmatprep.subr.bf16.mxu0 %v1995_v0 }
  0x64   :  { %1720 = vmatpush3.bf16.msra.mxu0 %v233_v23 }
  0x65   :  { %1731 = vmatprep.subr.bf16.mxu0 %v1995_v0 }
  0x67   :  { %1722 = vmatmul.mubr.msk.bf16.vlgmr.msra.gmra.mxu0 %vm133_vm1, %v228_v26 }
  0x68   :  { %1733 = vmatprep.mubr.msk.bf16.mxu0 %vm1996_vm0, %v1995_v0 }
 0x11d   :  { %v221_v27 = vpop.f32.mrf.mxu1 }
 0x11e   :  { %434 = vrot.lane.b32.xlu1 %v221_v27, %s1997_s4  ;;  %428 = vrot.lane.b32.xlu0 %v221_v27, %s1998_s6 }
 0x11f   :  { %v171_v28 = vpop.f32.mrf.mxu0  ;;  %v1715_v29 = vpop.f32.mrf.mxu1 }
 0x120   :  { %v2108_v35 = vmul.f32 0.35355338, %v171_v28 }
 0x121   :  { %v1707_v30 = vpop.f32.mrf.mxu0  ;;  %v224_v31 = vpop.f32.mrf.mxu1 }
 0x122   :  { %440 = vrot.lane.b32.xlu0 %v221_v27, %s1999_s27  ;;  %436 = vrot.lane.b32.xlu1 %v224_v31, %s1997_s4 }
 0x123   :  { %v174_v32 = vpop.f32.mrf.mxu0  ;;  %v1716_v33 = vpop.f32.mrf.mxu1 }
 0x125   :  { %v1708_v34 = vpop.f32.mrf.mxu0 }
 0x126   :  { %442 = vrot.lane.b32.xlu1 %v224_v31, %s1999_s27  ;;  %430 = vrot.lane.b32.xlu0 %v224_v31, %s1998_s6 }
 0x127   :  { %v2116_v36 = vpop.f32.mrf.mxu0 }
 0x129   :  { %v1723_v37 = vpop.f32.mrf.mxu0 }
 0x12a   :  { %284 = vrot.lane.b32.xlu1 %v2108_v35, %s1997_s4  ;;  %281 = vrot.lane.b32.xlu0 %v2108_v35, %s1998_s6 }
 0x12b   :  { %v2119_v38 = vpop.f32.mrf.mxu0 }
 0x12d   :  { %v1724_v39 = vpop.f32.mrf.mxu0 }
 0x12e   :  { %287 = vrot.lane.b32.xlu0 %v2108_v35, %s1999_s27  ;;  %722 = vrot.lane.b32.xlu1 %v2119_v38, %s1998_s6 }
 0x132   :  { %720 = vrot.lane.b32.xlu0 %v2116_v36, %s1998_s6 }
 0x190   :  { %v435_v47 = vpop.permute.xlu1 %434  ;;  %v429_v48 = vpop.permute.xlu0 %428 }
 0x191   :  { %v446_v51 = vcombine.low %v221_v27, %v435_v47  ;;  %v447_v52 = vcombine.high %v221_v27, %v435_v47 }
 0x193   :  { %v454_v58 = vrot.slane %v446_v51, %v2122_v50  ;;  %v461_v59 = vrot.slane %v447_v52, %v2122_v50 }
 0x194   :  { %v441_v53 = vpop.permute.xlu0 %440  ;;  %v437_v54 = vpop.permute.xlu1 %436 }
 0x195   :  { %v462_v55 = vcombine.low %v429_v48, %v441_v53  ;;  %v463_v56 = vcombine.high %v429_v48, %v441_v53  ;;  %v514_v62 = vcombine.low %v224_v31, %v437_v54  ;;  %v515_v63 = vcombine.high %v224_v31, %v437_v54 }
 0x197   :  { %v470_v60 = vrot.slane %v462_v55, %v2122_v50  ;;  %v477_v61 = vrot.slane %v463_v56, %v2122_v50  ;;  %v522_v13 = vrot.slane %v514_v62, %v2122_v50  ;;  %v529_v14 = vrot.slane %v515_v63, %v2122_v50 }
 0x198   :  { %v443_v1 = vpop.permute.xlu1 %442  ;;  %v431_v2 = vpop.permute.xlu0 %430 }
 0x199   :  { %v478_v3 = vcombine.low %v454_v58, %v470_v60  ;;  %v479_v4 = vcombine.high %v454_v58, %v470_v60  ;;  %v494_v5 = vcombine.low %v461_v59, %v477_v61  ;;  %v495_v6 = vcombine.high %v461_v59, %v477_v61 }
 0x19a   :  { %v530_v7 = vcombine.low %v431_v2, %v443_v1  ;;  %v531_v8 = vcombine.high %v431_v2, %v443_v1 }
 0x19b   :  { %v486_v9 = vrot.slane %v478_v3, %v2124_v57  ;;  %v493_v10 = vrot.slane %v479_v4, %v2124_v57  ;;  %v502_v11 = vrot.slane %v494_v5, %v2124_v57  ;;  %v509_v12 = vrot.slane %v495_v6, %v2124_v57 }
 0x19c   :  { %v538_v15 = vrot.slane %v530_v7, %v2122_v50  ;;  %v545_v16 = vrot.slane %v531_v8, %v2122_v50  ;;  %v282_v17 = vpop.permute.xlu0 %281  ;;  %v285_v26 = vpop.permute.xlu1 %284 }
 0x19d   :  { %v582_v18 = vcombine.low %v486_v9, %v493_v10  ;;  %v1654_v19 = vcombine.high %v486_v9, %v493_v10  ;;  %v598_v20 = vcombine.low %v502_v11, %v509_v12  ;;  %v1655_v21 = vcombine.high %v502_v11, %v509_v12 }
 0x19e   :  { %v546_v22 = vcombine.low %v522_v13, %v538_v15  ;;  %v547_v23 = vcombine.high %v522_v13, %v538_v15  ;;  %v562_v24 = vcombine.low %v529_v14, %v545_v16  ;;  %v563_v25 = vcombine.high %v529_v14, %v545_v16 }
 0x19f   :  { %v2139_v27 = vrot.slane %v582_v18, %v2122_v50  ;;  %v2142_v28 = vrot.slane %v1654_v19, %v2122_v50  ;;  %v2145_v29 = vrot.slane %v598_v20, %v2122_v50  ;;  %v2148_v30 = vrot.slane %v1655_v21, %v2122_v50 }
 0x1a0   :  { %v554_v31 = vrot.slane %v546_v22, %v2124_v57  ;;  %v561_v32 = vrot.slane %v547_v23, %v2124_v57  ;;  %v570_v33 = vrot.slane %v562_v24, %v2124_v57  ;;  %v577_v34 = vrot.slane %v563_v25, %v2124_v57  ;;  %v288_v37 = vpop.permute.xlu0 %287 }
 0x1a1   :  { %v290_v39 = vcombine.low %v2108_v35, %v285_v26  ;;  %v291_v40 = vcombine.high %v2108_v35, %v285_v26  ;;  %v306_v41 = vcombine.low %v282_v17, %v288_v37  ;;  %v307_v42 = vcombine.high %v282_v17, %v288_v37 }
 0x1a2   :  { %v650_v43 = vcombine.low %v554_v31, %v561_v32  ;;  %v1656_v44 = vcombine.high %v554_v31, %v561_v32  ;;  %v666_v45 = vcombine.low %v570_v33, %v577_v34  ;;  %v1657_v46 = vcombine.high %v570_v33, %v577_v34 }
 0x1a3   :  { %v298_v47 = vrot.slane %v290_v39, %v2122_v50  ;;  %v305_v48 = vrot.slane %v291_v40, %v2122_v50  ;;  %v314_v49 = vrot.slane %v306_v41, %v2122_v50  ;;  %v321_v51 = vrot.slane %v307_v42, %v2122_v50 }
 0x1a4   :  { %v657_v52 = vrot.slane %v650_v43, %v2122_v50  ;;  %v665_v53 = vrot.slane %v1656_v44, %v2122_v50  ;;  %v673_v35 = vrot.slane %v666_v45, %v2122_v50  ;;  %v681_v54 = vrot.slane %v1657_v46, %v2122_v50 }
 0x1a5   :  { %v322_v55 = vcombine.low %v298_v47, %v314_v49  ;;  %v323_v56 = vcombine.high %v298_v47, %v314_v49  ;;  %v338_v58 = vcombine.low %v305_v48, %v321_v51  ;;  %v339_v59 = vcombine.high %v305_v48, %v321_v51 }
 0x1a6   :  { %v614_v60 = vcombine.low %v2139_v27, %v2142_v28  ;;  %v630_v61 = vcombine.low %v2145_v29, %v2148_v30  ;;  %v682_v62 = vcombine.low %v657_v52, %v665_v53  ;;  %v698_v63 = vcombine.low %v673_v35, %v681_v54 }
 0x1a7   :  { %v330_v1 = vrot.slane %v322_v55, %v2124_v57  ;;  %v337_v2 = vrot.slane %v323_v56, %v2124_v57  ;;  %v346_v3 = vrot.slane %v338_v58, %v2124_v57  ;;  %v353_v4 = vrot.slane %v339_v59, %v2124_v57 }
 0x1a8   :  { %v622_v5 = vrot.slane %v614_v60, %v2124_v57  ;;  %v638_v6 = vrot.slane %v630_v61, %v2124_v57  ;;  %v690_v7 = vrot.slane %v682_v62, %v2124_v57  ;;  %v706_v8 = vrot.slane %v698_v63, %v2124_v57 }
 0x1a9   :  { %v358_v9 = vcombine.low %v330_v1, %v337_v2  ;;  %v1652_v10 = vcombine.high %v330_v1, %v337_v2  ;;  %v374_v11 = vcombine.low %v346_v3, %v353_v4  ;;  %v1653_v12 = vcombine.high %v346_v3, %v353_v4 }
 0x1aa   :  { %v646_v13 = vcombine.low %v622_v5, %v638_v6  ;;  %v714_v14 = vcombine.low %v690_v7, %v706_v8  ;;  %v647_v15 = vcombine.high %v622_v5, %v638_v6  ;;  %v715_v16 = vcombine.high %v690_v7, %v706_v8 }
 0x1ab   :  { %v365_v17 = vrot.slane %v358_v9, %v2122_v50  ;;  %v373_v18 = vrot.slane %v1652_v10, %v2122_v50  ;;  %v381_v19 = vrot.slane %v374_v11, %v2122_v50  ;;  %v389_v20 = vrot.slane %v1653_v12, %v2122_v50 }
 0x1ac   :  { %v1014_v21 = vpack.c.bf16 %v714_v14, %v646_v13  ;;  %v1015_v22 = vpack.c.bf16 %v715_v16, %v647_v15  ;;  %v615_v23 = vcombine.high %v2139_v27, %v2142_v28  ;;  %v631_v24 = vcombine.high %v2145_v29, %v2148_v30 }
 0x1ad   :  { %v390_v25 = vcombine.low %v365_v17, %v373_v18  ;;  %v406_v26 = vcombine.low %v381_v19, %v389_v20  ;;  %v683_v37 = vcombine.high %v657_v52, %v665_v53  ;;  %v699_v29 = vcombine.high %v673_v35, %v681_v54 }
 0x1ae   :  { %v1023_v31 = vsel %vm1018_vm2, %v1014_v21, 0  ;;  %v1069_v32 = vsel %vm1018_vm2, %v1015_v22, 0  ;;  %v629_v27 = vrot.slane %v615_v23, %v2124_v57  ;;  %v645_v28 = vrot.slane %v631_v24, %v2124_v57 }
 0x1af   :  { %1726 = vmatpush3.bf16.xpose.msra.mxu1 %v1023_v31  ;;  %1732 = vmatpush3.bf16.xpose.msra.mxu0 %v1069_v32  ;;  %v398_v33 = vrot.slane %v390_v25, %v2124_v57  ;;  %v414_v34 = vrot.slane %v406_v26, %v2124_v57  ;;  %v391_v30 = vcombine.high %v365_v17, %v373_v18  ;;  %v721_v18 = vpop.permute.xlu0 %720 }
 0x1b0   :  { %1737 = vmatprep.subr.bf16.mxu1 %v1995_v0  ;;  %1743 = vmatprep.subr.bf16.mxu0 %v1995_v0  ;;  %v697_v41 = vrot.slane %v683_v37, %v2124_v57  ;;  %v407_v42 = vcombine.high %v381_v19, %v389_v20  ;;  %v713_v43 = vrot.slane %v699_v29, %v2124_v57  ;;  %v723_v19 = vpop.permute.xlu1 %722 }
 0x1b1   :  { %v422_v39 = vcombine.low %v398_v33, %v414_v34  ;;  %v423_v40 = vcombine.high %v398_v33, %v414_v34  ;;  %v648_v46 = vcombine.low %v629_v27, %v645_v28  ;;  %v649_v48 = vcombine.high %v629_v27, %v645_v28 }
 0x1b2   :  { %v716_v47 = vcombine.low %v697_v41, %v713_v43  ;;  %v717_v49 = vcombine.high %v697_v41, %v713_v43  ;;  %v405_v51 = vrot.slane %v391_v30, %v2124_v57  ;;  %v421_v35 = vrot.slane %v407_v42, %v2124_v57 }
 0x1b3   :  { %v1010_v44 = vpack.c.bf16 %v422_v39, %v422_v39  ;;  %v1011_v45 = vpack.c.bf16 %v423_v40, %v423_v40 }
 0x1b4   :  { %v1016_v52 = vpack.c.bf16 %v716_v47, %v648_v46  ;;  %v1017_v53 = vpack.c.bf16 %v717_v49, %v649_v48  ;;  %v424_v56 = vcombine.low %v405_v51, %v421_v35  ;;  %v425_v58 = vcombine.high %v405_v51, %v421_v35 }
 0x1b6   :  { %1728 = vmatmul.mubr.msk.bf16.vlgmr.msra.gmra.mxu1 %vm1018_vm2, %v1010_v44  ;;  %1734 = vmatmul.mubr.msk.bf16.vlgmr.msra.gmra.mxu0 %vm1018_vm2, %v1011_v45  ;;  %v1115_v54 = vsel %vm1018_vm2, %v1016_v52, 0  ;;  %v1161_v55 = vsel %vm1018_vm2, %v1017_v53, 0  ;;  %v1012_v59 = vpack.c.bf16 %v424_v56, %v424_v56  ;;  %v1013_v60 = vpack.c.bf16 %v425_v58, %v425_v58 }
 0x1b7   :  { %1739 = vmatprep.mubr.msk.bf16.mxu1 %vm1996_vm0, %v1995_v0  ;;  %1745 = vmatprep.mubr.msk.bf16.mxu0 %vm1996_vm0, %v1995_v0 }
 0x1b8   :  { %1738 = vmatpush3.bf16.xpose.msra.mxu1 %v1115_v54  ;;  %1744 = vmatpush3.bf16.xpose.msra.mxu0 %v1161_v55 }
 0x1b9   :  { %1749 = vmatprep.subr.bf16.mxu1 %v1995_v0  ;;  %1755 = vmatprep.subr.bf16.mxu0 %v1995_v0 }
 0x1bf   :  { %1740 = vmatmul.mubr.msk.bf16.vlgmr.msra.gmra.mxu1 %vm1018_vm2, %v1012_v59  ;;  %1746 = vmatmul.mubr.msk.bf16.vlgmr.msra.gmra.mxu0 %vm1018_vm2, %v1013_v60 }
 0x1c0   :  { %1751 = vmatprep.mubr.msk.bf16.mxu1 %vm1996_vm0, %v1995_v0  ;;  %1757 = vmatprep.mubr.msk.bf16.mxu0 %vm1996_vm0, %v1995_v0 }
 0x276   :  { %v1059_v61 = vpop.f32.mrf.mxu1  ;;  %v1105_v62 = vpop.f32.mrf.mxu0 }
 0x277   :  { %v1204_v63 = vsel %vm1203_vm3, %v1059_v61, -inf  ;;  %v1207_v1 = vsel %vm1203_vm3, %v1105_v62, -inf }
 0x278   :  { %v1729_v2 = vpop.f32.mrf.mxu1  ;;  %1205 = vmax.xlane.f32.xlu1 %v1204_v63  ;;  %1208 = vmax.xlane.f32.xlu0 %v1207_v1  ;;  %v1735_v3 = vpop.f32.mrf.mxu0 }
 0x27a   :  { %v1062_v4 = vpop.f32.mrf.mxu1  ;;  %v1108_v5 = vpop.f32.mrf.mxu0 }
 0x27c   :  { %v1730_v6 = vpop.f32.mrf.mxu1  ;;  %v1736_v7 = vpop.f32.mrf.mxu0 }
 0x27f   :  { %v1151_v8 = vpop.f32.mrf.mxu1  ;;  %v1197_v9 = vpop.f32.mrf.mxu0 }
 0x280   :  { %v1210_v10 = vsel %vm1203_vm3, %v1151_v8, -inf  ;;  %v1213_v11 = vsel %vm1203_vm3, %v1197_v9, -inf }
 0x281   :  { %v1741_v12 = vpop.f32.mrf.mxu1  ;;  %1211 = vmax.xlane.f32.xlu0 %v1210_v10  ;;  %1214 = vmax.xlane.f32.xlu1 %v1213_v11  ;;  %v1747_v13 = vpop.f32.mrf.mxu0 }
 0x283   :  { %v1154_v14 = vpop.f32.mrf.mxu1  ;;  %v1200_v15 = vpop.f32.mrf.mxu0 }
 0x285   :  { %v1742_v16 = vpop.f32.mrf.mxu1  ;;  %v1748_v17 = vpop.f32.mrf.mxu0 }
 0x292   :  { %726 = vrot.lane.b32.xlu1 %v2116_v36, %s1997_s4 }
 0x297   :  { %728 = vrot.lane.b32.xlu0 %v2119_v38, %s1997_s4 }
 0x301   :  { %v1206_v20 = vpop.xlane.xlu1 %1205  ;;  %v1209_v21 = vpop.xlane.xlu0 %1208 }
 0x302   :  { %v1216_v22 = vsub.f32 %v1059_v61, %v1206_v20  ;;  %v1217_v23 = vsub.f32 %v1105_v62, %v1209_v21 }
 0x304   :  { %v1220_v24 = vmul.f32 1.442695, %v1216_v22  ;;  %v1222_v25 = vmul.f32 1.442695, %v1217_v23 }
 0x306   :  { %1800 = vpow2.f32 %v1220_v24 }
 0x307   :  { %1802 = vpow2.f32 %v1222_v25 }
 0x30a   :  { %v1215_v34 = vpop.xlane.xlu1 %1214  ;;  %v1212_v37 = vpop.xlane.xlu0 %1211 }
 0x30b   :  { %v1219_v27 = vsub.f32 %v1197_v9, %v1215_v34  ;;  %v1218_v28 = vsub.f32 %v1151_v8, %v1212_v37 }
 0x30d   :  { %v1226_v29 = vmul.f32 1.442695, %v1219_v27  ;;  %v1224_v30 = vmul.f32 1.442695, %v1218_v28 }
 0x30e   :  { %v729_v43 = vpop.permute.xlu0 %728  ;;  %v727_v44 = vpop.permute.xlu1 %726 }
 0x30f   :  { %1804 = vpow2.f32 %v1226_v29  ;;  %v806_v47 = vcombine.low %v2119_v38, %v729_v43  ;;  %v807_v48 = vcombine.high %v2119_v38, %v729_v43  ;;  %v738_v49 = vcombine.low %v2116_v36, %v727_v44 }
 0x310   :  { %1806 = vpow2.f32 %v1224_v30  ;;  %v739_v51 = vcombine.high %v2116_v36, %v727_v44 }
 0x311   :  { %v814_v55 = vrot.slane %v806_v47, %v2122_v50  ;;  %v821_v59 = vrot.slane %v807_v48, %v2122_v50  ;;  %v746_v61 = vrot.slane %v738_v49, %v2122_v50 }
 0x313   :  { %v2220_v26 = vpop.eup %1800 }
 0x314   :  { %v2222_v31 = vpop.eup %1802  ;;  %v1228_v32 = vsel %vm1203_vm3, %v2220_v26, 0.0 }
 0x315   :  { %1229 = vadd.xlane.f32.xlu0 %v1228_v32  ;;  %v1231_v33 = vsel %vm1203_vm3, %v2222_v31, 0.0 }
 0x316   :  { %1232 = vadd.xlane.f32.xlu1 %v1231_v33 }
 0x31c   :  { %v2232_v39 = vpop.eup %1804 }
 0x31d   :  { %v2234_v40 = vpop.eup %1806  ;;  %v1237_v41 = vsel %vm1203_vm3, %v2232_v39, 0.0 }
 0x31e   :  { %v1234_v42 = vsel %vm1203_vm3, %v2234_v40, 0.0 }
 0x327   :  { %732 = vrot.lane.b32.xlu1 %v2116_v36, %s1999_s27  ;;  %v753_v36 = vrot.slane %v739_v51, %v2122_v50 }
 0x32b   :  { %734 = vrot.lane.b32.xlu0 %v2119_v38, %s1999_s27 }
 0x34a   :  { %1238 = vadd.xlane.f32.xlu0 %v1237_v41 }
 0x34b   :  { %1235 = vadd.xlane.f32.xlu1 %v1234_v42 }
 0x39e   :  { %v1230_v45 = vpop.xlane.xlu0 %1229 }
 0x39f   :  { %v1233_v46 = vpop.xlane.xlu1 %1232  ;;  %1808 = vrcp.f32 %v1230_v45 }
 0x3a0   :  { %1810 = vrcp.f32 %v1233_v46 }
 0x3a2   :  { %v735_v52 = vpop.permute.xlu0 %734 }
 0x3a3   :  { %v822_v53 = vcombine.low %v723_v19, %v735_v52  ;;  %v823_v35 = vcombine.high %v723_v19, %v735_v52  ;;  %v733_v54 = vpop.permute.xlu1 %732 }
 0x3a4   :  { %v754_v56 = vcombine.low %v721_v18, %v733_v54  ;;  %v755_v58 = vcombine.high %v721_v18, %v733_v54 }
 0x3a5   :  { %v830_v60 = vrot.slane %v822_v53, %v2122_v50  ;;  %v837_v38 = vrot.slane %v823_v35, %v2122_v50 }
 0x3a6   :  { %v762_v62 = vrot.slane %v754_v56, %v2122_v50  ;;  %v769_v63 = vrot.slane %v755_v58, %v2122_v50 }
 0x3a7   :  { %v838_v1 = vcombine.low %v814_v55, %v830_v60  ;;  %v839_v2 = vcombine.high %v814_v55, %v830_v60  ;;  %v854_v3 = vcombine.low %v821_v59, %v837_v38  ;;  %v855_v4 = vcombine.high %v821_v59, %v837_v38 }
 0x3a8   :  { %v770_v5 = vcombine.low %v746_v61, %v762_v62  ;;  %v771_v6 = vcombine.high %v746_v61, %v762_v62  ;;  %v786_v7 = vcombine.low %v753_v36, %v769_v63  ;;  %v787_v8 = vcombine.high %v753_v36, %v769_v63 }
 0x3a9   :  { %v846_v9 = vrot.slane %v838_v1, %v2124_v57  ;;  %v853_v10 = vrot.slane %v839_v2, %v2124_v57  ;;  %v862_v11 = vrot.slane %v854_v3, %v2124_v57  ;;  %v869_v12 = vrot.slane %v855_v4, %v2124_v57 }
 0x3aa   :  { %v778_v13 = vrot.slane %v770_v5, %v2124_v57  ;;  %v785_v14 = vrot.slane %v771_v6, %v2124_v57  ;;  %v794_v15 = vrot.slane %v786_v7, %v2124_v57  ;;  %v801_v16 = vrot.slane %v787_v8, %v2124_v57 }
 0x3ab   :  { %v942_v17 = vcombine.low %v846_v9, %v853_v10  ;;  %v1660_v18 = vcombine.high %v846_v9, %v853_v10  ;;  %v958_v19 = vcombine.low %v862_v11, %v869_v12  ;;  %v1661_v20 = vcombine.high %v862_v11, %v869_v12 }
 0x3ac   :  { %v874_v21 = vcombine.low %v778_v13, %v785_v14  ;;  %v1658_v22 = vcombine.high %v778_v13, %v785_v14  ;;  %v890_v23 = vcombine.low %v794_v15, %v801_v16  ;;  %v1659_v24 = vcombine.high %v794_v15, %v801_v16  ;;  %v1809_v46 = vpop.eup %1808 }
 0x3ad   :  { %v949_v25 = vrot.slane %v942_v17, %v2122_v50  ;;  %v957_v32 = vrot.slane %v1660_v18, %v2122_v50  ;;  %v965_v33 = vrot.slane %v958_v19, %v2122_v50  ;;  %v973_v34 = vrot.slane %v1661_v20, %v2122_v50  ;;  %v1811_v49 = vpop.eup %1810 }
 0x3ae   :  { %v881_v37 = vrot.slane %v874_v21, %v2122_v50  ;;  %v889_v27 = vrot.slane %v1658_v22, %v2122_v50  ;;  %v897_v28 = vrot.slane %v890_v23, %v2122_v50  ;;  %v905_v29 = vrot.slane %v1659_v24, %v2122_v50 }
 0x3af   :  { %v974_v30 = vcombine.low %v949_v25, %v957_v32  ;;  %v990_v41 = vcombine.low %v965_v33, %v973_v34  ;;  %v975_v56 = vcombine.high %v949_v25, %v957_v32  ;;  %v991_v58 = vcombine.high %v965_v33, %v973_v34 }
 0x3b0   :  { %v906_v42 = vcombine.low %v881_v37, %v889_v27  ;;  %v922_v43 = vcombine.low %v897_v28, %v905_v29  ;;  %v907_v44 = vcombine.high %v881_v37, %v889_v27  ;;  %v923_v45 = vcombine.high %v897_v28, %v905_v29 }
 0x3b1   :  { %v982_v47 = vrot.slane %v974_v30, %v2124_v57  ;;  %v998_v48 = vrot.slane %v990_v41, %v2124_v57  ;;  %v1244_v38 = vmul.f32 %v1809_v46, %v2220_v26  ;;  %v1245_v61 = vmul.f32 %v1811_v49, %v2222_v31  ;;  %v1583_v49 = vld [vmem:[#allocation13 + $0x10] sm:$0xff] }
 0x3b2   :  { %v914_v51 = vrot.slane %v906_v42, %v2124_v57  ;;  %v930_v52 = vrot.slane %v922_v43, %v2124_v57  ;;  %v921_v53 = vrot.slane %v907_v44, %v2124_v57  ;;  %v937_v35 = vrot.slane %v923_v45, %v2124_v57 }
 0x3b3   :  { %v1006_v54 = vcombine.low %v982_v47, %v998_v48  ;;  %v1007_v55 = vcombine.high %v982_v47, %v998_v48  ;;  %v989_v36 = vrot.slane %v975_v56, %v2124_v57  ;;  %v1005_v62 = vrot.slane %v991_v58, %v2124_v57 }
 0x3b4   :  { %v938_v59 = vcombine.low %v914_v51, %v930_v52  ;;  %v939_v60 = vcombine.high %v914_v51, %v930_v52  ;;  %v940_v2 = vcombine.low %v921_v53, %v937_v35  ;;  %v941_v3 = vcombine.high %v921_v53, %v937_v35  ;;  %v1584_v51 = vld [vmem:[#allocation13 + $0x18] sm:$0xff] }
 0x3b5   :  { %v1008_v4 = vcombine.low %v989_v36, %v1005_v62  ;;  %v1009_v5 = vcombine.high %v989_v36, %v1005_v62  ;;  %v1248_v6 = vpack.c.bf16 %v1244_v38, %v1244_v38  ;;  %v1249_v7 = vpack.c.bf16 %v1245_v61, %v1245_v61 }
 0x3b6   :  { %v1252_v63 = vpack.c.bf16 %v1006_v54, %v938_v59  ;;  %v1253_v1 = vpack.c.bf16 %v1007_v55, %v939_v60  ;;  %v1586_v55 = vpack.c.bf16 %v1584_v51, %v1583_v49 }
 0x3b7   :  { %v1254_v26 = vpack.c.bf16 %v1008_v4, %v940_v2  ;;  %v1255_v31 = vpack.c.bf16 %v1009_v5, %v941_v3 }
 0x3b8   :  { %1750 = vmatpush3.bf16.msra.mxu1 %v1252_v63  ;;  %1756 = vmatpush3.bf16.msra.mxu0 %v1253_v1  ;;  %v1581_v63 = vld [vmem:[#allocation13] sm:$0xff]  ;;  %v1582_v1 = vld [vmem:[#allocation13 + $0x8] sm:$0xff] }
 0x3b9   :  { %1761 = vmatprep.subr.bf16.mxu1 %v1995_v0  ;;  %1767 = vmatprep.subr.bf16.mxu0 %v1995_v0  ;;  %v1585_v2 = vpack.c.bf16 %v1582_v1, %v1581_v63 }
 0x3bb   :  { %1752 = vmatmul.mubr.msk.bf16.vlgmr.msra.gmra.mxu1 %vm1203_vm3, %v1248_v6  ;;  %1758 = vmatmul.mubr.msk.bf16.vlgmr.msra.gmra.mxu0 %vm1203_vm3, %v1249_v7 }
 0x3bc   :  { %1762 = vmatpush3.bf16.msra.mxu1 %v1254_v26  ;;  %1768 = vmatpush3.bf16.msra.mxu0 %v1255_v31 }
 0x3bd   :  { %1763 = vmatprep.mubr.msk.bf16.mxu1 %vm1996_vm0, %v1995_v0  ;;  %1769 = vmatprep.mubr.msk.bf16.mxu0 %vm1996_vm0, %v1995_v0 }
 0x3be   :  { %1773 = vmatprep.subr.bf16.mxu1 %v1995_v0 }
 0x3d3   :  { %v1239_v8 = vpop.xlane.xlu0 %1238 }
 0x3d4   :  { %1812 = vrcp.f32 %v1239_v8  ;;  %v1236_v9 = vpop.xlane.xlu1 %1235 }
 0x3d5   :  { %1814 = vrcp.f32 %v1236_v9 }
 0x3e1   :  { %v1813_v10 = vpop.eup %1812 }
 0x3e2   :  { %v1815_v11 = vpop.eup %1814  ;;  %v1247_v12 = vmul.f32 %v1813_v10, %v2232_v39 }
 0x3e3   :  { %v1246_v13 = vmul.f32 %v1815_v11, %v2234_v40 }
 0x3e4   :  { %v1251_v14 = vpack.c.bf16 %v1247_v12, %v1247_v12 }
 0x3e5   :  { %v1250_v15 = vpack.c.bf16 %v1246_v13, %v1246_v13 }
 0x3e6   :  { %1770 = vmatmul.mubr.msk.bf16.vlgmr.msra.gmra.mxu0 %vm1203_vm3, %v1251_v14 }
 0x3e7   :  { %1764 = vmatmul.mubr.msk.bf16.vlgmr.msra.gmra.mxu1 %vm1203_vm3, %v1250_v15 }
 0x3e8   :  { %1777 = vmatprep.mubr.msk.bf16.mxu1 %vm1996_vm0, %v1995_v0  ;;  %1774 = vmatpush3.bf16.msra.mxu1 %v1586_v55 }
 0x3e9   :  { %1775 = vmatprep.subr.bf16.mxu1 %v1995_v0 }
 0x3ec   :  { %1776 = vmatpush3.bf16.msra.mxu1 %v1585_v2 }
 0x47b   :  { %v1293_v16 = vpop.f32.mrf.mxu1  ;;  %v1336_v17 = vpop.f32.mrf.mxu0 }
 0x47d   :  { %v1753_v18 = vpop.f32.mrf.mxu1  ;;  %v1759_v19 = vpop.f32.mrf.mxu0 }
 0x47f   :  { %v1296_v20 = vpop.f32.mrf.mxu1  ;;  %v1339_v21 = vpop.f32.mrf.mxu0 }
 0x481   :  { %v1754_v22 = vpop.f32.mrf.mxu1  ;;  %v1760_v23 = vpop.f32.mrf.mxu0 }
 0x4a6   :  { %v1422_v39 = vpop.f32.mrf.mxu0 }
 0x4a7   :  { %v1379_v24 = vpop.f32.mrf.mxu1  ;;  %v1444_v40 = vcombine.low %v1336_v17, %v1422_v39  ;;  %v1445_v25 = vcombine.high %v1336_v17, %v1422_v39 }
 0x4a8   :  { %v1428_v32 = vcombine.low %v1293_v16, %v1379_v24  ;;  %v1429_v33 = vcombine.high %v1293_v16, %v1379_v24  ;;  %v1771_v34 = vpop.f32.mrf.mxu0 }
 0x4a9   :  { %v1452_v37 = vrot.slane %v1444_v40, %v2122_v50  ;;  %v1459_v27 = vrot.slane %v1445_v25, %v2122_v50  ;;  %v1765_v28 = vpop.f32.mrf.mxu1 }
 0x4aa   :  { %v1436_v29 = vrot.slane %v1428_v32, %v2122_v50  ;;  %v1443_v30 = vrot.slane %v1429_v33, %v2122_v50  ;;  %v1425_v41 = vpop.f32.mrf.mxu0 }
 0x4ab   :  { %v1382_v42 = vpop.f32.mrf.mxu1 }
 0x4ac   :  { %v1460_v43 = vcombine.low %v1436_v29, %v1452_v37  ;;  %v1461_v44 = vcombine.high %v1436_v29, %v1452_v37  ;;  %v1476_v45 = vcombine.low %v1443_v30, %v1459_v27  ;;  %v1477_v46 = vcombine.high %v1443_v30, %v1459_v27  ;;  %v1772_v47 = vpop.f32.mrf.mxu0 }
 0x4ad   :  { %v1766_v48 = vpop.f32.mrf.mxu1 }
 0x4ae   :  { %v1468_v52 = vrot.slane %v1460_v43, %v2124_v57  ;;  %v1475_v53 = vrot.slane %v1461_v44, %v2124_v57  ;;  %v1484_v35 = vrot.slane %v1476_v45, %v2124_v57  ;;  %v1491_v54 = vrot.slane %v1477_v46, %v2124_v57 }
 0x4b0   :  { %v1496_v56 = vcombine.low %v1468_v52, %v1475_v53  ;;  %v1670_v58 = vcombine.high %v1468_v52, %v1475_v53  ;;  %v1512_v59 = vcombine.low %v1484_v35, %v1491_v54  ;;  %v1671_v60 = vcombine.high %v1484_v35, %v1491_v54 }
 0x4b2   :  { %v1503_v38 = vrot.slane %v1496_v56, %v2122_v50  ;;  %v1511_v61 = vrot.slane %v1670_v58, %v2122_v50  ;;  %v1519_v36 = vrot.slane %v1512_v59, %v2122_v50  ;;  %v1527_v62 = vrot.slane %v1671_v60, %v2122_v50 }
 0x4b4   :  { %v1529_v3 = vcombine.high %v1503_v38, %v1511_v61  ;;  %v1545_v4 = vcombine.high %v1519_v36, %v1527_v62  ;;  %v1528_v5 = vcombine.low %v1503_v38, %v1511_v61  ;;  %v1544_v6 = vcombine.low %v1519_v36, %v1527_v62 }
 0x4b6   :  { %v1543_v7 = vrot.slane %v1529_v3, %v2124_v57  ;;  %v1559_v26 = vrot.slane %v1545_v4, %v2124_v57  ;;  %v1536_v31 = vrot.slane %v1528_v5, %v2124_v57  ;;  %v1552_v8 = vrot.slane %v1544_v6, %v2124_v57 }
 0x4b8   :  { %v1562_v9 = vcombine.low %v1543_v7, %v1559_v26  ;;  %v1561_v50 = vcombine.high %v1536_v31, %v1552_v8  ;;  %v1560_v10 = vcombine.low %v1536_v31, %v1552_v8  ;;  %v1563_v0 = vcombine.high %v1543_v7, %v1559_v26 }
 0x4ba   :  { %1569 = vrot.lane.b32.xlu1 %v1562_v9, %s2002_s12  ;;  %1565 = vrot.lane.b32.xlu0 %v1561_v50, %s1988_s28  ;;  %s1956_s28 = scalar_lea.vmem %s1638_s1, 128 }
 0x4bb   :  { %p1957_p7 = scmp.ne.s32.totalorder %s1638_s1, %s1956_s28  ;;  %p1962_p9 = scmp.lt.s32.totalorder %s1956_s28, %s1956_s28 }
 0x4bd   :  { %p1963_p10 = por %p1962_p9, %p1961_p8 }
 0x4be   :  { %1573 = vrot.lane.b32.xlu1 %v1563_v0, %s2003_s13 }
 0x4bf   :  { %p1964_p11 = pnand %p1963_p10, %p1957_p7 }
 0x52c   :  { %v1570_v11 = vpop.permute.xlu1 %1569  ;;  %v1566_v12 = vpop.permute.xlu0 %1565 }
 0x52d   :  { %v1576_v13 = vsel %vm1018_vm2, %v1560_v10, %v1566_v12 }
 0x52e   :  { %v1577_v15 = vsel %vm1203_vm3, %v1576_v13, %v1570_v11 }
 0x530   :  { %v1574_v14 = vpop.permute.xlu1 %1573 }
 0x531   :  { %v1579_v16 = vsel %vm1578_vm4, %v1577_v15, %v1574_v14 }
 0x532   :  { %v1580_v57 = vpack.c.bf16 %v1579_v16, %v1579_v16 }
 0x534   :  { %1778 = vmatmul.mubr.msk.bf16.vlgmr.msra.gmra.mxu1 %vm133_vm1, %v1580_v57 }
 0x5f4   :  { %v1624_v17 = vpop.f32.mrf.mxu1 }
 0x5f5   :  { %1630 = vst.msk [vmem:[#allocation14] sm:$0xff] %vm133_vm1, %v1624_v17 }
 0x5f6   :  { %v1779_v18 = vpop.f32.mrf.mxu1 }
 0x5f7   :  { %1967 = shalt.err (!%p1964_p11)
}
 0x5f8   :  { %1640 = dma.vmem_to_hbm [thread:$0]  %s1638_s1, 128, %s2325_s7, [#allocation4]   ;;  %v1627_v19 = vpop.f32.mrf.mxu1 }
 0x5fa   :  { %v1780_v20 = vpop.f32.mrf.mxu1 }
 0x5fb   :  { %1984 = dma.done.wait [#allocation4], 128  }
 0x5fc   :  { %1985 = vsyncadd [#allocation4], 4294967168 }
 0x5fd   :  { %1644 = vsyncpa [#allocation3], 1 }
 0x5fe   :  { %1645 = vsyncpa [#allocation6], 1 }
 0x5ff   :  { %1646 = vsyncpa [#allocation9], 1 }
 0x600   :  { %1647 = vsyncpa [#allocation12], 1 }
 0x601   :  { %1648 = vsyncpa [#allocation4], 1 }

</bundles_post_ra>
